<compile_context>
chip_gen: v5e
topology: v5e:2x2
jax: 0.10.0
libtpu: 0.0.40
codegen_flags: <defaults>
</compile_context>

<pallas_src>
import jax
import jax.numpy as jnp
from jax import lax
from jax.experimental import pallas as pl
from jax.experimental.pallas import tpu as pltpu

IMAGE_WEIGHT = 0.5
DISPLACEMENT_WEIGHT = 0.5

_LANE = 128                    # lane width of the lane-dense MSE slab
_SUBLANE = 8
_MSE_BLOCK_BYTES = 4 << 20     # ~4 MiB per input block (x2 inputs x2 buffers)
_DISP_BLOCK_BYTES = 4 << 20    # ~4 MiB displacement block
_VMEM_LIMIT_BYTES = 32 << 20   # explicit scoped-VMEM limit (safe on v5e/v6e/v7x)
_CORE_SPLIT = 2                # leading "parallel" axis -> both v7x TensorCores


# --------------------------------------------------------------------------
# sum((y_pred - y_true)^2)
# --------------------------------------------------------------------------
def _sum_sq_diff(y_pred, y_true, block_bytes=_MSE_BLOCK_BYTES):
    """Tiled, core-split reduction of sum((y_pred - y_true)^2). No padding."""
    n = int(y_pred.size)
    # Lane-dense (rows, 128) view when free; otherwise use the natural last
    # dim as lane dim (full-dim block, always a free contiguous reshape).
    lane = _LANE if n % _LANE == 0 else int(y_pred.shape[-1])
    rows = n // lane
    yp2 = y_pred.reshape(rows, lane)
    yt2 = y_true.reshape(rows, lane)

    row_bytes = lane * y_pred.dtype.itemsize
    br = (block_bytes // max(row_bytes, 1)) // _SUBLANE * _SUBLANE
    br = max(_SUBLANE, br)
    if br >= rows:
        br = rows                              # single full block per core
    nb = pl.cdiv(rows, br)                     # total row blocks
    bpc = pl.cdiv(nb, _CORE_SPLIT)             # row blocks per core

    def kernel(yp_ref, yt_ref, out_ref, acc_ref):
        c = pl.program_id(0)                   # core-split axis ("parallel")
        i = pl.program_id(1)                   # reduction axis ("arbitrary")

        @pl.when(i == 0)
        def _init():
            acc_ref[...] = jnp.zeros_like(acc_ref)

        d = yp_ref[...].astype(jnp.float32) - yt_ref[...].astype(jnp.float32)
        sq = d * d
        row_start = (c * bpc + i) * br         # unclamped global row of block

        @pl.when(row_start + br <= rows)       # fully valid block: no mask cost
        def _full():
            acc_ref[...] += jnp.sum(sq, axis=0, keepdims=True)

        @pl.when(row_start + br > rows)        # tail / duplicated block: mask
        def _tail():
            rid = lax.broadcasted_iota(jnp.int32, sq.shape, 0) + row_start
            acc_ref[...] += jnp.sum(jnp.where(rid < rows, sq, 0.0),
                                    axis=0, keepdims=True)

        @pl.when(i == pl.num_programs(1) - 1)  # store per-core partial once
        def _store():
            out_ref[0] = acc_ref[...]

    def idx(c, i):
        # Clamp so duplicated iterations (odd block counts / tiny inputs) stay
        # in bounds; their contribution is zeroed by the row mask above.
        return (jnp.minimum(c * bpc + i, nb - 1), 0)

    out = pl.pallas_call(
        kernel,
        out_shape=jax.ShapeDtypeStruct((_CORE_SPLIT, 1, lane), jnp.float32),
        grid=(_CORE_SPLIT, bpc),
        in_specs=[pl.BlockSpec((br, lane), idx),
                  pl.BlockSpec((br, lane), idx)],
        out_specs=pl.BlockSpec((1, 1, lane), lambda c, i: (c, 0, 0)),
        scratch_shapes=[pltpu.VMEM((1, lane), jnp.float32)],
        compiler_params=pltpu.CompilerParams(
            dimension_semantics=("parallel", "arbitrary"),
            vmem_limit_bytes=_VMEM_LIMIT_BYTES),
    )(yp2, yt2)
    # Single cross-lane/cross-core reduce of the tiny (2, 1, lane) partials.
    return jnp.sum(out)


# --------------------------------------------------------------------------
# (sum(dH^2), sum(dW^2)) of the displacement field
# --------------------------------------------------------------------------
def _disp_grad_sums(displacement, block_bytes=_DISP_BLOCK_BYTES):
    """Forward-difference gradient sums over full (H, W) planes (halo-free)."""
    B, C, H, W = displacement.shape
    planes = B * C
    d3 = displacement.reshape(planes, H, W)    # contiguous, free reshape

    plane_bytes = H * W * displacement.dtype.itemsize
    ppb = int(max(1, min(planes, block_bytes // max(plane_bytes, 1))))
    nblk = pl.cdiv(planes, ppb)
    need_mask = (planes % ppb) != 0            # mask only if last block partial

    def kernel(d_ref, out_ref):
        i = pl.program_id(0)

        @pl.when(i == 0)
        def _init():
            out_ref[0] = jnp.float32(0.0)
            out_ref[1] = jnp.float32(0.0)

        d = d_ref[...].astype(jnp.float32)     # (ppb, H, W) whole planes
        if H > 1:
            dh = d[:, 1:, :] - d[:, :-1, :]
            if need_mask:
                pid = lax.broadcasted_iota(jnp.int32, dh.shape, 0) + i * ppb
                dh = jnp.where(pid < planes, dh, 0.0)
            out_ref[0] += jnp.sum(dh * dh)
        if W > 1:
            dw = d[:, :, 1:] - d[:, :, :-1]
            if need_mask:
                pid = lax.broadcasted_iota(jnp.int32, dw.shape, 0) + i * ppb
                dw = jnp.where(pid < planes, dw, 0.0)
            out_ref[1] += jnp.sum(dw * dw)

    out = pl.pallas_call(
        kernel,
        out_shape=jax.ShapeDtypeStruct((2,), jnp.float32),
        grid=(nblk,),
        in_specs=[pl.BlockSpec((ppb, H, W), lambda i: (i, 0, 0))],
        out_specs=pl.BlockSpec(memory_space=pltpu.MemorySpace.SMEM),
        compiler_params=pltpu.CompilerParams(
            dimension_semantics=("arbitrary",),
            vmem_limit_bytes=_VMEM_LIMIT_BYTES),
    )(d3)
    return out[0], out[1]


# --------------------------------------------------------------------------
# Combined loss
# --------------------------------------------------------------------------
def combined_image_displacement_loss(y_pred, y_true, displacement,
                                     image_weight=IMAGE_WEIGHT,
                                     displacement_weight=DISPLACEMENT_WEIGHT):
    """image_weight * MSE(y_pred, y_true)
       + displacement_weight * (mean(dH^2) + mean(dW^2))."""
    sq_sum = _sum_sq_diff(y_pred, y_true)
    dh_sum, dw_sum = _disp_grad_sums(displacement)

    B, C, H, W = displacement.shape
    n_img = y_pred.size
    n_dh = B * C * (H - 1) * W
    n_dw = B * C * H * (W - 1)

    # Fold each mean's 1/N and the loss weights into compile-time constants;
    # single fused scalar epilogue.  Degenerate H==1 / W==1 terms are dropped
    # instead of dividing by zero.
    loss = (image_weight / n_img) * sq_sum
    if n_dh > 0:
        loss = loss + (displacement_weight / n_dh) * dh_sum
    if n_dw > 0:
        loss = loss + (displacement_weight / n_dw) * dw_sum
    return loss


# --------------------------------------------------------------------------
# Reference + self-test
# --------------------------------------------------------------------------
def _reference_loss(y_pred, y_true, displacement):
    yp = y_pred.astype(jnp.float32)
    yt = y_true.astype(jnp.float32)
    mse = jnp.mean((yp - yt) ** 2)
    d = displacement.astype(jnp.float32)
    dh = d[:, :, 1:, :] - d[:, :, :-1, :]
    dw = d[:, :, :, 1:] - d[:, :, :, :-1]
    grad = jnp.mean(dh * dh) + jnp.mean(dw * dw)
    return IMAGE_WEIGHT * mse + DISPLACEMENT_WEIGHT * grad


if __name__ == "__main__":
    key = jax.random.PRNGKey(0)
    k1, k2, k3 = jax.random.split(key, 3)

    B, C, H, W = 2, 4, 16, 16
    y_pred = jax.random.normal(k1, (B, C, H, W), dtype=jnp.float32)
    y_true = jax.random.normal(k2, (B, C, H, W), dtype=jnp.float32)
    displacement = jax.random.normal(k3, (B, 2, H, W), dtype=jnp.float32)

    loss_fn = jax.jit(combined_image_displacement_loss)
    loss = loss_fn(y_pred, y_true, displacement)
    loss = jax.block_until_ready(loss)

    ref = _reference_loss(y_pred, y_true, displacement)
    assert jnp.allclose(loss, ref, rtol=1e-5, atol=1e-5), (loss, ref)

    print("KERNEL_OK")
</pallas_src>

<mosaic_0001>
module attributes {stable_mosaic.version = 11 : i64} {
  func.func @kernel(%arg0: i32, %arg1: i32, %arg2: memref<16x128xf32, #tpu.memory_space<vmem>>, %arg3: memref<16x128xf32, #tpu.memory_space<vmem>>, %arg4: memref<1x1x128xf32, #tpu.memory_space<vmem>>, %arg5: memref<1x128xf32, #tpu.memory_space<vmem>>) attributes {dimension_semantics = [#tpu.dimension_semantics<parallel>, #tpu.dimension_semantics<arbitrary>], iteration_bounds = array<i64: 2, 1>, scalar_prefetch = 0 : i64, scratch_operands = 1 : i64, tpu.core_type = #tpu.core_type<tc>, window_params = [{transform_indices = @transform_0, window_bounds = array<i64: 16, 128>}, {transform_indices = @transform_1, window_bounds = array<i64: 16, 128>}, {transform_indices = @transform_2, window_bounds = array<i64: 1, 1, 128>}]} {
    %c0_i32 = arith.constant 0 : i32
    %0 = arith.cmpi eq, %arg1, %c0_i32 : i32
    %1 = arith.extui %0 : i1 to i32
    %c0_i32_0 = arith.constant 0 : i32
    %2 = arith.cmpi ne, %1, %c0_i32_0 : i32
    scf.if %2 {
      %cst = arith.constant 0.000000e+00 : f32
      %21 = vector.broadcast %cst : f32 to vector<1x128xf32>
      %c0_12 = arith.constant 0 : index
      %c0_13 = arith.constant 0 : index
      %22 = vector.load %arg5[%c0_12, %c0_13] : memref<1x128xf32, #tpu.memory_space<vmem>>, vector<1x128xf32>
      tpu.vector_store %arg5[%c0_12, %c0_13], %21 {strides = array<i32>} : memref<1x128xf32, #tpu.memory_space<vmem>>, vector<1x128xf32>,
    } else {
    }
    %c0 = arith.constant 0 : index
    %c0_1 = arith.constant 0 : index
    %3 = vector.load %arg2[%c0, %c0_1] : memref<16x128xf32, #tpu.memory_space<vmem>>, vector<16x128xf32>
    %c0_2 = arith.constant 0 : index
    %c0_3 = arith.constant 0 : index
    %4 = vector.load %arg3[%c0_2, %c0_3] : memref<16x128xf32, #tpu.memory_space<vmem>>, vector<16x128xf32>
    %5 = arith.subf %3, %4 : vector<16x128xf32>
    %6 = arith.mulf %5, %5 : vector<16x128xf32>
    %c1_i32 = arith.constant 1 : i32
    %7 = arith.muli %arg0, %c1_i32 : i32
    %8 = arith.addi %7, %arg1 : i32
    %c16_i32 = arith.constant 16 : i32
    %9 = arith.muli %8, %c16_i32 : i32
    %c16_i32_4 = arith.constant 16 : i32
    %10 = arith.addi %9, %c16_i32_4 : i32
    %c16_i32_5 = arith.constant 16 : i32
    %11 = arith.cmpi sle, %10, %c16_i32_5 : i32
    %12 = arith.extui %11 : i1 to i32
    %c0_i32_6 = arith.constant 0 : i32
    %13 = arith.cmpi ne, %12, %c0_i32_6 : i32
    scf.if %13 {
      %c0_12 = arith.constant 0 : index
      %c0_13 = arith.constant 0 : index
      %21 = vector.load %arg5[%c0_12, %c0_13] : memref<1x128xf32, #tpu.memory_space<vmem>>, vector<1x128xf32>
      %cst = arith.constant dense<0.000000e+00> : vector<128xf32>
      %22 = vector.multi_reduction <add>, %6, %cst [0] : vector<16x128xf32> to vector<128xf32>
      %23 = vector.shape_cast %22 : vector<128xf32> to vector<1x128xf32>
      %24 = arith.addf %21, %23 : vector<1x128xf32>
      %c0_14 = arith.constant 0 : index
      %c0_15 = arith.constant 0 : index
      %25 = vector.load %arg5[%c0_14, %c0_15] : memref<1x128xf32, #tpu.memory_space<vmem>>, vector<1x128xf32>
      tpu.vector_store %arg5[%c0_14, %c0_15], %24 {strides = array<i32>} : memref<1x128xf32, #tpu.memory_space<vmem>>, vector<1x128xf32>,
    } else {
    }
    %c16_i32_7 = arith.constant 16 : i32
    %14 = arith.addi %9, %c16_i32_7 : i32
    %c16_i32_8 = arith.constant 16 : i32
    %15 = arith.cmpi sgt, %14, %c16_i32_8 : i32
    %16 = arith.extui %15 : i1 to i32
    %c0_i32_9 = arith.constant 0 : i32
    %17 = arith.cmpi ne, %16, %c0_i32_9 : i32
    scf.if %17 {
      %21 = tpu.iota {dimensions = array<i32: 0>} : vector<16x128xi32>
      %22 = vector.broadcast %9 : i32 to vector<16x128xi32>
      %23 = arith.addi %21, %22 : vector<16x128xi32>
      %c0_12 = arith.constant 0 : index
      %c0_13 = arith.constant 0 : index
      %24 = vector.load %arg5[%c0_12, %c0_13] : memref<1x128xf32, #tpu.memory_space<vmem>>, vector<1x128xf32>
      %c16_i32_14 = arith.constant 16 : i32
      %25 = vector.broadcast %c16_i32_14 : i32 to vector<16x128xi32>
      %26 = arith.cmpi slt, %23, %25 : vector<16x128xi32>
      %cst = arith.constant 0.000000e+00 : f32
      %27 = vector.broadcast %cst : f32 to vector<16x128xf32>
      %28 = arith.select %26, %6, %27 : vector<16x128xi1>, vector<16x128xf32>
      %cst_15 = arith.constant dense<0.000000e+00> : vector<128xf32>
      %29 = vector.multi_reduction <add>, %28, %cst_15 [0] : vector<16x128xf32> to vector<128xf32>
      %30 = vector.shape_cast %29 : vector<128xf32> to vector<1x128xf32>
      %31 = arith.addf %24, %30 : vector<1x128xf32>
      %c0_16 = arith.constant 0 : index
      %c0_17 = arith.constant 0 : index
      %32 = vector.load %arg5[%c0_16, %c0_17] : memref<1x128xf32, #tpu.memory_space<vmem>>, vector<1x128xf32>
      tpu.vector_store %arg5[%c0_16, %c0_17], %31 {strides = array<i32>} : memref<1x128xf32, #tpu.memory_space<vmem>>, vector<1x128xf32>,
    } else {
    }
    %c0_i32_10 = arith.constant 0 : i32
    %18 = arith.cmpi eq, %arg1, %c0_i32_10 : i32
    %19 = arith.extui %18 : i1 to i32
    %c0_i32_11 = arith.constant 0 : i32
    %20 = arith.cmpi ne, %19, %c0_i32_11 : i32
    scf.if %20 {
      %c0_12 = arith.constant 0 : index
      %c0_13 = arith.constant 0 : index
      %21 = vector.load %arg5[%c0_12, %c0_13] : memref<1x128xf32, #tpu.memory_space<vmem>>, vector<1x128xf32>
      %c0_14 = arith.constant 0 : index
      %c0_15 = arith.constant 0 : index
      %c0_16 = arith.constant 0 : index
      %22 = vector.load %arg4[%c0_14, %c0_15, %c0_16] : memref<1x1x128xf32, #tpu.memory_space<vmem>>, vector<1x1x128xf32>
      %23 = vector.shape_cast %22 : vector<1x1x128xf32> to vector<1x128xf32>
      %24 = vector.shape_cast %21 : vector<1x128xf32> to vector<1x1x128xf32>
      tpu.vector_store %arg4[%c0_14, %c0_15, %c0_16], %24 {strides = array<i32>} : memref<1x1x128xf32, #tpu.memory_space<vmem>>, vector<1x1x128xf32>,
    } else {
    }
    return
  }
  func.func @transform_0(%arg0: i32, %arg1: i32) -> (i32, i32) {
    %c1_i32 = arith.constant 1 : i32
    %0 = arith.muli %arg0, %c1_i32 : i32
    %1 = arith.addi %0, %arg1 : i32
    %c0_i32 = arith.constant 0 : i32
    %2 = arith.minsi %1, %c0_i32 : i32
    %c0_i32_0 = arith.constant 0 : i32
    %c0_i32_1 = arith.constant 0 : i32
    return %2, %c0_i32_0 : i32, i32
  }
  func.func @transform_1(%arg0: i32, %arg1: i32) -> (i32, i32) {
    %c1_i32 = arith.constant 1 : i32
    %0 = arith.muli %arg0, %c1_i32 : i32
    %1 = arith.addi %0, %arg1 : i32
    %c0_i32 = arith.constant 0 : i32
    %2 = arith.minsi %1, %c0_i32 : i32
    %c0_i32_0 = arith.constant 0 : i32
    %c0_i32_1 = arith.constant 0 : i32
    return %2, %c0_i32_0 : i32, i32
  }
  func.func @transform_2(%arg0: i32, %arg1: i32) -> (i32, i32, i32) {
    %c0_i32 = arith.constant 0 : i32
    %c0_i32_0 = arith.constant 0 : i32
    %c0_i32_1 = arith.constant 0 : i32
    return %arg0, %c0_i32, %c0_i32_0 : i32, i32, i32
  }
}

module attributes {stable_mosaic.version = 11 : i64} {
  func.func @kernel(%arg0: i32, %arg1: memref<4x16x16xf32, #tpu.memory_space<vmem>>, %arg2: memref<2xf32, #tpu.memory_space<smem>>) attributes {dimension_semantics = [#tpu.dimension_semantics<arbitrary>], iteration_bounds = array<i64: 1>, scalar_prefetch = 0 : i64, scratch_operands = 0 : i64, tpu.core_type = #tpu.core_type<tc>, window_params = [{transform_indices = @transform_0, window_bounds = array<i64: 4, 16, 16>}, {transform_indices = @transform_1, window_bounds = array<i64: 2>}]} {
    %c0_i32 = arith.constant 0 : i32
    %0 = arith.cmpi eq, %arg0, %c0_i32 : i32
    %1 = arith.extui %0 : i1 to i32
    %c0_i32_0 = arith.constant 0 : i32
    %2 = arith.cmpi ne, %1, %c0_i32_0 : i32
    scf.if %2 {
      %cst_7 = arith.constant 0.000000e+00 : f32
      %c0_8 = arith.constant 0 : index
      %26 = memref.load %arg2[%c0_8] : memref<2xf32, #tpu.memory_space<smem>>
      memref.store %cst_7, %arg2[%c0_8] : memref<2xf32, #tpu.memory_space<smem>>
      %cst_9 = arith.constant 0.000000e+00 : f32
      %c1_10 = arith.constant 1 : index
      %27 = memref.load %arg2[%c1_10] : memref<2xf32, #tpu.memory_space<smem>>
      memref.store %cst_9, %arg2[%c1_10] : memref<2xf32, #tpu.memory_space<smem>>
    } else {
    }
    %c0 = arith.constant 0 : index
    %c0_1 = arith.constant 0 : index
    %c0_2 = arith.constant 0 : index
    %3 = vector.load %arg1[%c0, %c0_1, %c0_2] : memref<4x16x16xf32, #tpu.memory_space<vmem>>, vector<4x16x16xf32>
    %4 = vector.extract_strided_slice %3 {offsets = [0, 1, 0], sizes = [4, 15, 16], strides = [1, 1, 1]} : vector<4x16x16xf32> to vector<4x15x16xf32>
    %5 = vector.extract_strided_slice %3 {offsets = [0, 0, 0], sizes = [4, 15, 16], strides = [1, 1, 1]} : vector<4x16x16xf32> to vector<4x15x16xf32>
    %6 = arith.subf %4, %5 : vector<4x15x16xf32>
    %c0_3 = arith.constant 0 : index
    %7 = memref.load %arg2[%c0_3] : memref<2xf32, #tpu.memory_space<smem>>
    %8 = arith.mulf %6, %6 : vector<4x15x16xf32>
    %9 = vector.shape_cast %8 : vector<4x15x16xf32> to vector<1x4x15x16xf32>
    %cst = arith.constant dense<0.000000e+00> : vector<1xf32>
    %10 = vector.multi_reduction <add>, %9, %cst [1, 2, 3] : vector<1x4x15x16xf32> to vector<1xf32>
    %11 = vector.shape_cast %10 : vector<1xf32> to vector<1x1x1x1xf32>
    %12 = vector.extract %11[0, 0, 0, 0] : f32 from vector<1x1x1x1xf32>
    %13 = arith.addf %7, %12 : f32
    %c0_4 = arith.constant 0 : index
    %14 = memref.load %arg2[%c0_4] : memref<2xf32, #tpu.memory_space<smem>>
    memref.store %13, %arg2[%c0_4] : memref<2xf32, #tpu.memory_space<smem>>
    %15 = vector.extract_strided_slice %3 {offsets = [0, 0, 1], sizes = [4, 16, 15], strides = [1, 1, 1]} : vector<4x16x16xf32> to vector<4x16x15xf32>
    %16 = vector.extract_strided_slice %3 {offsets = [0, 0, 0], sizes = [4, 16, 15], strides = [1, 1, 1]} : vector<4x16x16xf32> to vector<4x16x15xf32>
    %17 = arith.subf %15, %16 : vector<4x16x15xf32>
    %c1 = arith.constant 1 : index
    %18 = memref.load %arg2[%c1] : memref<2xf32, #tpu.memory_space<smem>>
    %19 = arith.mulf %17, %17 : vector<4x16x15xf32>
    %20 = vector.shape_cast %19 : vector<4x16x15xf32> to vector<1x4x16x15xf32>
    %cst_5 = arith.constant dense<0.000000e+00> : vector<1xf32>
    %21 = vector.multi_reduction <add>, %20, %cst_5 [1, 2, 3] : vector<1x4x16x15xf32> to vector<1xf32>
    %22 = vector.shape_cast %21 : vector<1xf32> to vector<1x1x1x1xf32>
    %23 = vector.extract %22[0, 0, 0, 0] : f32 from vector<1x1x1x1xf32>
    %24 = arith.addf %18, %23 : f32
    %c1_6 = arith.constant 1 : index
    %25 = memref.load %arg2[%c1_6] : memref<2xf32, #tpu.memory_space<smem>>
    memref.store %24, %arg2[%c1_6] : memref<2xf32, #tpu.memory_space<smem>>
    return
  }
  func.func @transform_0(%arg0: i32) -> (i32, i32, i32) {
    %c0_i32 = arith.constant 0 : i32
    %c0_i32_0 = arith.constant 0 : i32
    %c0_i32_1 = arith.constant 0 : i32
    return %arg0, %c0_i32, %c0_i32_0 : i32, i32, i32
  }
  func.func @transform_1(%arg0: i32) -> i32 {
    %c0_i32 = arith.constant 0 : i32
    %c0_i32_0 = arith.constant 0 : i32
    return %c0_i32 : i32
  }
}

</mosaic_0001>

<bundles_post_ra>
// kernel: combined_image_displacement_loss.2
= control target key start
LH: loop header
LB: loop body
LE: loop exit
PB: predicated region body
PF: predicated region fallthrough
CT: control target
= control target key end

     0   :  { %s423_s9 = smov 0   ;;  %s425_s10 = smov 0   ;;  %s478_s0 = inlined_call_operand.vmem [shape: f32[16,128], index: 0, kind: input, shape index: {}]   ;;  %s479_s1 = inlined_call_operand.vmem [shape: f32[16,128], index: 1, kind: input, shape index: {}]   ;;  %s480_s2 = inlined_call_operand.vmem [shape: f32[2,1,128], index: 2, kind: output, shape index: {}]  }
   0x1   :  { %s427_s11 = smov 0  }
   0x2 LB: > { %s24_s12 = sadd.s32 1, %s401_s10  ;;  %p348_p0 = scmp.ge.s32.totalorder %s405_s11, 1  ;;  %s405_s11 = sphi %s427_s11, %s12_s11   ;;  %s401_s10 = sphi %s425_s10, %s482_s10   ;;  %s397_s9 = sphi %s423_s9, %s481_s9  }
   0x3   : > { %p26_p1 = scmp.ge.s32.totalorder %s24_s12, 2  ;;  %p160_p2 = scmp.lt.s32.totalorder %s405_s11, 3 }
   0x5   : > { %s484_s12 = smov (%p26_p1, %s24_s12), 0  ;;  %p161_p3 = pnand %p348_p0, %p160_p2 }
   0x6   : > { %p192_p4 = scmp.lt.s32.totalorder (!%p161_p3), %s397_s9, 0  ;;  %p215_p5 = scmp.lt.s32.totalorder (!%p161_p3), %s397_s9, 1 }
   0x7   : > { %164 = sbr.rel (%p161_p3) target bundleno = 85 (0x55), region = 28  ;;  %s353_s13 = sshll.u32 (!%p161_p3), %s397_s9, 4 }
   0x8   : > { %s233_s17 = sadd.s32 (!%p161_p3), 16, %s353_s13 }
   0x9   : > { %p354_p7 = scmp.gt.s32.totalorder (!%p161_p3), %s233_s17, 16 }
   0xc   : > { %v407_v0 = vmov 0.0   ;;  %s193_s14 = scalar_select %p192_p4, %s397_s9, 0 }
   0xd   : > { %222 = vst [vmem:[#allocation2] sm:$0x1] %v407_v0  ;;  %s448_s15 = scalar_select %p215_p5, %s397_s9, 1 }
   0xe   : > { %s349_s16 = sshll.u32 %s193_s14, 1 }
   0xf   : > { %p195_p6 = scmp.lt.s32.totalorder %s349_s16, 1  ;;  %s217_s20 = scalar_lea.vmem %s480_s2, %s448_s15 }
  0x11   : > { %s486_s16 = smov (!%p195_p6, %s349_s16), 1 }
  0x12   : > { %s350_s21 = sshll.u32 %s486_s16, 3 }
  0x13   : > { %s198_s24 = scalar_lea.vmem %s478_s0, %s350_s21  ;;  %s210_s27 = scalar_lea.vmem %s479_s1, %s350_s21 }
  0x14   : > { %v223_v1 = vld [vmem:[%s198_s24] sm:$0xff]  ;;  %v224_v2 = vld [vmem:[%s198_s24 + $0x8] sm:$0xff]  ;;  %237 = sbr.rel (%p354_p7) target bundleno = 43 (0x2b), region = 36 }
  0x15   : > { %v225_v3 = vld [vmem:[%s210_s27] sm:$0xff]  ;;  %v226_v4 = vld [vmem:[%s210_s27 + $0x8] sm:$0xff] }
  0x16   : > { %v227_v5 = vsub.f32 %v223_v1, %v225_v3  ;;  %v228_v6 = vsub.f32 %v224_v2, %v226_v4 }
  0x18   : > { %v229_v7 = vmul.f32 %v227_v5, %v227_v5  ;;  %v230_v8 = vmul.f32 %v228_v6, %v228_v6 }
  0x19   : > { %v238_v15 = vld [vmem:[#allocation2] sm:$0x1] }
  0x1a   : > { %v239_v9 = vadd.f32 %v230_v8, %v229_v7 }
  0x1c   : > { %v240_v10 = vrot.slane %v239_v9, 4 }
  0x1e   : > { %v241_v11 = vadd.f32 %v240_v10, %v239_v9 }
  0x20   : > { %v242_v12 = vrot.slane %v241_v11, 2 }
  0x22   : > { %v243_v13 = vadd.f32 %v242_v12, %v241_v11 }
  0x24   : > { %v244_v14 = vrot.slane %v243_v13, 1 }
  0x26   : > { %v245_v16 = vadd.f32 %v244_v14, %v243_v13 }
  0x28   : > { %v246_v17 = vadd.f32 %v245_v16, %v238_v15 }
  0x2a   : > { %247 = vst [vmem:[#allocation2] sm:$0x1] %v246_v17 }
  0x2b PF: > { %p355_p8 = scmp.le.s32.totalorder %s233_s17, 16 }
  0x2d   : > { %251 = sbr.rel (%p355_p8) target bundleno = 77 (0x4d), region = 40 }
  0x32   : > { %v252_v18 = vlaneseq  ;;  %v255_v19 = vstv %s353_s13  ;;  %v258_v32 = vld [vmem:[#allocation2] sm:$0x1] }
  0x34   : > { %v253_v20 = vshrl.u32 %v252_v18, 7 }
  0x36   : > { %v254_v21 = vadd.s32 8, %v253_v20  ;;  %v256_v22 = vadd.s32 %v255_v19, %v253_v20 }
  0x38   : > { %v257_v23 = vadd.s32 %v255_v19, %v254_v21  ;;  %vm259_vm0 = vcmp.lt.s32.totalorder %v256_v22, 16 }
  0x39   : > { %v261_v24 = vsel %vm259_vm0, %v229_v7, 0.0 }
  0x3a   : > { %vm260_vm1 = vcmp.lt.s32.totalorder %v257_v23, 16 }
  0x3b   : > { %v262_v25 = vsel %vm260_vm1, %v230_v8, 0.0 }
  0x3c   : > { %v263_v26 = vadd.f32 %v262_v25, %v261_v24 }
  0x3e   : > { %v264_v27 = vrot.slane %v263_v26, 4 }
  0x40   : > { %v265_v28 = vadd.f32 %v264_v27, %v263_v26 }
  0x42   : > { %v266_v29 = vrot.slane %v265_v28, 2 }
  0x44   : > { %v267_v30 = vadd.f32 %v266_v29, %v265_v28 }
  0x46   : > { %v268_v31 = vrot.slane %v267_v30, 1 }
  0x48   : > { %v269_v33 = vadd.f32 %v268_v31, %v267_v30 }
  0x4a   : > { %v270_v34 = vadd.f32 %v269_v33, %v258_v32 }
  0x4c   : > { %271 = vst [vmem:[#allocation2] sm:$0x1] %v270_v34 }
  0x4d PF:  {}
  0x53   : > { %v275_v35 = vld [vmem:[#allocation2] sm:$0x1] }
  0x54   : > { %276 = vst [vmem:[%s217_s20] sm:$0x1] %v275_v35 }
  0x55 PF: > { %s12_s11 = sadd.s32 1, %s405_s11   ;;  %s481_s9 = smov %s401_s10 }
  0x56   : > { %p9_p9 = scmp.ge.s32.totalorder %s12_s11, 4   ;;  %s482_s10 = smov %s484_s12 }
  0x58   :  { %11 = sbr.rel (!%p9_p9) target bundleno = 2 (0x2), region = 77 }

// kernel: combined_image_displacement_loss.3
= control target key start
LH: loop header
LB: loop body
LE: loop exit
PB: predicated region body
PF: predicated region fallthrough
CT: control target
= control target key end

     0   :  { %s268_s10 = smov 1   ;;  %s356_s0 = inlined_call_operand.vmem [shape: f32[4,16,16], index: 0, kind: input, shape index: {}]   ;;  %s357_s1 = inlined_call_operand.vmem [shape: f32[2], index: 1, kind: output, shape index: {}]  }
   0x1   :  { %v17_v0 = vld [vmem:[%s356_s0] sm:$0xff]  ;;  %v19_v1 = vld [vmem:[%s356_s0 + $0x10] sm:$0xff] }
   0x2   :  { %129 = vrot.lane.b32.xlu0 %v17_v0, %s268_s10  ;;  %133 = vrot.lane.b32.xlu1 %v19_v1, %s268_s10  ;;  %v290_v2 = vld [vmem:[%s356_s0 + $0x20] sm:$0xff] }
   0x3   :  { %137 = vrot.lane.b32.xlu2 %v290_v2, %s268_s10 }
   0x4   :  { %6 = vsyncpa [#allocation3], 0  ;;  %v18_v3 = vld [vmem:[%s356_s0 + $0x8] sm:$0xff]  ;;  %v20_v4 = vld [vmem:[%s356_s0 + $0x18] sm:$0xff]  ;;  %s269_s23 = smov 127   ;;  %v34_v32 = vrot.slane %v17_v0, 7 }
   0x5   :  { %v302_v5 = vld [vmem:[%s356_s0 + $0x28] sm:$0xff]  ;;  %v308_v6 = vld [vmem:[%s356_s0 + $0x38] sm:$0xff]  ;;  %v313_v7 = vld [vmem:[%s356_s0 + $0x30] sm:$0xff]  ;;  %v35_v33 = vrot.slane %v18_v3, 7  ;;  %vm33_vm0 = vcmask 1040384   ;;  %v37_v34 = vrot.slane %v19_v1, 7 }
   0x6   :  { %v38_v35 = vrot.slane %v20_v4, 7  ;;  %v54_v38 = vsub.f32 %v17_v0, %v34_v32  ;;  %v40_v40 = vrot.slane %v290_v2, 7  ;;  %v41_v41 = vrot.slane %v302_v5, 7  ;;  %s235_s26 = sshll.u32 %s357_s1, 4  ;;  %s270_s28 = smov [#allocation2]   ;;  %s236_s26 = int_to_ptr.vmem [resolvable:$true] %s235_s26 }
   0x7   :  { %v36_v36 = vsel %vm33_vm0, %v34_v32, %v35_v33  ;;  %v56_v42 = vsub.f32 %v19_v1, %v37_v34  ;;  %v43_v50 = vrot.slane %v313_v7, 7  ;;  %v44_v58 = vrot.slane %v308_v6, 7 }
   0x8   :  { %v39_v37 = vsel %vm33_vm0, %v37_v34, %v38_v35  ;;  %v55_v39 = vsub.f32 %v18_v3, %v36_v36  ;;  %v63_v44 = vmul.f32 %v54_v38, %v54_v38  ;;  %v42_v46 = vsel %vm33_vm0, %v40_v40, %v41_v41 }
   0x9   :  { %v57_v43 = vsub.f32 %v20_v4, %v39_v37  ;;  %v65_v47 = vmul.f32 %v56_v42, %v56_v42  ;;  %v58_v49 = vsub.f32 %v290_v2, %v40_v40  ;;  %v59_v53 = vsub.f32 %v302_v5, %v42_v46 }
   0xa   :  { %131 = vrot.lane.b32.xlu0 %v18_v3, %s268_s10  ;;  %135 = vrot.lane.b32.xlu1 %v20_v4, %s268_s10  ;;  %v64_v45 = vmul.f32 %v55_v39, %v55_v39  ;;  %v80_v51 = vrot.slane %v63_v44, 1  ;;  %v60_v57 = vsub.f32 %v313_v7, %v43_v50  ;;  %vm79_vm1 = vcmask 1046528  }
   0xb   :  { %139 = vrot.lane.b32.xlu2 %v302_v5, %s268_s10  ;;  %v66_v48 = vmul.f32 %v57_v43, %v57_v43  ;;  %v83_v54 = vrot.slane %v65_v47, 1  ;;  %v67_v56 = vmul.f32 %v58_v49, %v58_v49  ;;  %v68_v59 = vmul.f32 %v59_v53, %v59_v53 }
   0xc   :  { %v81_v52 = vrot.slane %v64_v45, 1  ;;  %vm100_vm2 = vcmask 130048   ;;  %vm102_vm3 = vcmask 129024   ;;  %vm202_vm4 = vcmask 121856  }
   0xd   :  { %v84_v55 = vrot.slane %v66_v48, 1  ;;  %v86_v63 = vrot.slane %v67_v56, 1 }
   0xe   :  { %v82_v60 = vsel %vm79_vm1, %v80_v51, %v81_v52  ;;  %v103_v62 = vsel %vm102_vm3, %v81_v52, 0.0 }
   0xf   :  { %v101_v61 = vsel %vm100_vm2, %v82_v60, 0.0 }
  0x12   :  { %143 = vrot.lane.b32.xlu1 %v308_v6, %s268_s10  ;;  %141 = vrot.lane.b32.xlu0 %v313_v7, %s268_s10 }
  0x5d   :  { %v138_v8 = vpop.permute.xlu2 %137 }
  0x5e   :  { %v157_v24 = vsub.f32 %v290_v2, %v138_v8  ;;  %v104_v2 = vadd.f32 %v103_v62, %v101_v61 }
  0x60   :  { %v166_v28 = vmul.f32 %v157_v24, %v157_v24 }
  0x65   :  { %v140_v15 = vpop.permute.xlu2 %139 }
  0x66   :  { %v158_v16 = vsub.f32 %v302_v5, %v140_v15 }
  0x68   :  { %v167_v21 = vmul.f32 %v158_v16, %v158_v16 }
  0x74   :  { %v130_v9 = vpop.permute.xlu0 %129  ;;  %v134_v10 = vpop.permute.xlu1 %133 }
  0x75   :  { %v153_v11 = vsub.f32 %v17_v0, %v130_v9  ;;  %v155_v12 = vsub.f32 %v19_v1, %v134_v10  ;;  %v69_v0 = vmul.f32 %v60_v57, %v60_v57  ;;  %v85_v1 = vsel %vm79_vm1, %v83_v54, %v84_v55 }
  0x76   :  { %v107_v9 = vsel %vm102_vm3, %v84_v55, 0.0 }
  0x77   :  { %v162_v13 = vmul.f32 %v153_v11, %v153_v11  ;;  %v164_v14 = vmul.f32 %v155_v12, %v155_v12  ;;  %v89_v10 = vrot.slane %v69_v0, 1 }
  0x79   :  { %178 = vrot.lane.b32.xlu2 %v162_v13, %s269_s23  ;;  %182 = vrot.lane.b32.xlu1 %v164_v14, %s269_s23 }
  0x7c   :  { %v132_v17 = vpop.permute.xlu0 %131  ;;  %v136_v18 = vpop.permute.xlu1 %135 }
  0x7d   :  { %v154_v19 = vsub.f32 %v18_v3, %v132_v17  ;;  %v156_v20 = vsub.f32 %v20_v4, %v136_v18  ;;  %v45_v3 = vsel %vm33_vm0, %v43_v50, %v44_v58  ;;  %v105_v4 = vsel %vm100_vm2, %v85_v1, 0.0 }
  0x7e   :  { %v61_v5 = vsub.f32 %v308_v6, %v45_v3  ;;  %v106_v8 = vadd.f32 %v105_v4, %v104_v2 }
  0x7f   :  { %v163_v22 = vmul.f32 %v154_v19, %v154_v19  ;;  %v165_v23 = vmul.f32 %v156_v20, %v156_v20 }
  0x80   :  { %v70_v11 = vmul.f32 %v61_v5, %v61_v5  ;;  %v108_v13 = vadd.f32 %v107_v9, %v106_v8 }
  0x81   :  { %180 = vrot.lane.b32.xlu0 %v163_v22, %s269_s23  ;;  %184 = vrot.lane.b32.xlu2 %v165_v23, %s269_s23 }
  0x82   :  { %188 = vrot.lane.b32.xlu1 %v167_v21, %s269_s23  ;;  %v90_v15 = vrot.slane %v70_v11, 1 }
  0x84   :  { %v142_v25 = vpop.permute.xlu0 %141  ;;  %v144_v27 = vpop.permute.xlu1 %143  ;;  %v91_v18 = vsel %vm79_vm1, %v89_v10, %v90_v15  ;;  %v115_v21 = vsel %vm102_vm3, %v90_v15, 0.0 }
  0x85   :  { %v159_v26 = vsub.f32 %v313_v7, %v142_v25  ;;  %v160_v30 = vsub.f32 %v308_v6, %v144_v27  ;;  %v87_v7 = vrot.slane %v68_v59, 1  ;;  %v113_v6 = vsel %vm100_vm2, %v91_v18, 0.0 }
  0x87   :  { %v168_v29 = vmul.f32 %v159_v26, %v159_v26  ;;  %v169_v31 = vmul.f32 %v160_v30, %v160_v30  ;;  %v88_v12 = vsel %vm79_vm1, %v86_v63, %v87_v7  ;;  %v111_v17 = vsel %vm102_vm3, %v87_v7, 0.0 }
  0x88   :  { %v109_v14 = vsel %vm100_vm2, %v88_v12, 0.0 }
  0x89   :  { %186 = vrot.lane.b32.xlu0 %v166_v28, %s269_s23  ;;  %190 = vrot.lane.b32.xlu2 %v168_v29, %s269_s23  ;;  %v110_v16 = vadd.f32 %v109_v14, %v108_v13 }
  0x8b   :  { %v112_v19 = vadd.f32 %v111_v17, %v110_v16 }
  0x8d   :  { %v114_v20 = vadd.f32 %v113_v6, %v112_v19 }
  0x8f   :  { %v116_v22 = vadd.f32 %v115_v21, %v114_v20 }
  0x91   :  { %192 = vrot.lane.b32.xlu0 %v169_v31, %s269_s23 }
  0xac   :  { %117 = vadd.xlane.f32.xlu1 %v116_v22 }
  0xd3   :  { %v179_v23 = vpop.permute.xlu2 %178 }
  0xd4   :  { %v203_v26 = vsel %vm202_vm4, %v179_v23, 0.0 }
  0xdb   :  { %v185_v28 = vpop.permute.xlu2 %184 }
  0xdc   :  { %v208_v33 = vsel %vm202_vm4, %v185_v28, 0.0 }
  0xe3   :  { %v191_v39 = vpop.permute.xlu2 %190 }
  0xe4   :  { %v214_v41 = vsel %vm202_vm4, %v191_v39, 0.0 }
  0xeb   :  { %v183_v24 = vpop.permute.xlu1 %182 }
  0xec   :  { %v206_v30 = vsel %vm202_vm4, %v183_v24, 0.0 }
  0xf3   :  { %v181_v25 = vpop.permute.xlu0 %180 }
  0xf4   :  { %v204_v27 = vsel %vm202_vm4, %v181_v25, 0.0  ;;  %v189_v32 = vpop.permute.xlu1 %188 }
  0xf5   :  { %v205_v29 = vadd.f32 %v204_v27, %v203_v26  ;;  %v212_v37 = vsel %vm202_vm4, %v189_v32, 0.0 }
  0xf7   :  { %v207_v31 = vadd.f32 %v206_v30, %v205_v29 }
  0xf9   :  { %v209_v34 = vadd.f32 %v208_v33, %v207_v31 }
  0xfb   :  { %v187_v35 = vpop.permute.xlu0 %186 }
  0xfc   :  { %v210_v36 = vsel %vm202_vm4, %v187_v35, 0.0 }
  0xfd   :  { %v211_v38 = vadd.f32 %v210_v36, %v209_v34 }
  0xff   :  { %v213_v40 = vadd.f32 %v212_v37, %v211_v38 }
 0x101   :  { %v215_v42 = vadd.f32 %v214_v41, %v213_v40 }
 0x103   :  { %v193_v43 = vpop.permute.xlu0 %192 }
 0x104   :  { %v216_v44 = vsel %vm202_vm4, %v193_v43, 0.0 }
 0x105   :  { %v217_v45 = vadd.f32 %v216_v44, %v215_v42 }
 0x107   :  { %218 = vadd.xlane.f32.xlu2 %v217_v45 }
 0x11f   :  { %v118_v46 = vpop.xlane.xlu1 %117 }
 0x120   :  { %v119_v47 = vrot.slane %v118_v46, 4 }
 0x122   :  { %v120_v48 = vadd.f32 %v119_v47, %v118_v46 }
 0x124   :  { %v121_v49 = vrot.slane %v120_v48, 2 }
 0x126   :  { %v122_v50 = vadd.f32 %v121_v49, %v120_v48 }
 0x128   :  { %v123_v51 = vrot.slane %v122_v50, 1 }
 0x12a   :  { %v124_v52 = vadd.f32 %v123_v51, %v122_v50 }
 0x12c   :  { %246 = vpush %v124_v52 }
 0x15d   :  { %s247_s0 = spop %246 }
 0x15e   :  { %128 = sst [smem:[#allocation2]] %s247_s0 }
 0x17a   :  { %v219_v53 = vpop.xlane.xlu2 %218 }
 0x17b   :  { %v220_v54 = vrot.slane %v219_v53, 4 }
 0x17d   :  { %v221_v55 = vadd.f32 %v220_v54, %v219_v53 }
 0x17f   :  { %v222_v56 = vrot.slane %v221_v55, 2 }
 0x181   :  { %v223_v57 = vadd.f32 %v222_v56, %v221_v55 }
 0x183   :  { %v224_v58 = vrot.slane %v223_v57, 1 }
 0x185   :  { %v225_v59 = vadd.f32 %v224_v58, %v223_v57 }
 0x187   :  { %248 = vpush %v225_v59 }
 0x1b8   :  { %s249_s27 = spop %248 }
 0x1b9   :  { %229 = sst [smem:[#allocation2 + $0x1]] %s249_s27 }
 0x1ba   :  { %238 = dma.smem_to_vmem %s270_s28, 16, %s236_s26, [#allocation3]  }
 0x1bb   :  { %266 = dma.done.wait [#allocation3], 16  }
 0x1bc   :  { %267 = vsyncadd [#allocation3], 4294967280 }
 0x1bd   :  { %243 = sfence }
 0x1be   :  { %244 = vsyncpa [#allocation3], 1 }

</bundles_post_ra>
